<compile_context>
chip_gen: v7x
topology: tpu7x:2x2x1
jax: 0.10.0
libtpu: 0.0.40
codegen_flags: <defaults>
</compile_context>

<pallas_src>
import functools

import jax
import jax.numpy as jnp
from jax import lax
from jax.experimental import pallas as pl
from jax.experimental.pallas import tpu as pltpu


def _ngram_kernel(x_ref, m_ref, w_ref, b_ref, o_ref, *, kernel_sizes, coutp):
    """One grid step = one block of B_blk sequences.

    x_ref: (B_blk, S, Cin)          f32  raw inputs
    m_ref: (B_blk, S, 1)            f32  0/1 padding mask (masked_tensor)
    w_ref: (Cin, sum(kz)*coutp)     bf16 fused per-tap weight slab
    b_ref: (1, Cout)                f32  bias, Cout = coutp * len(kernel_sizes)
    o_ref: (1, B_blk, Cout)         f32  pooled n-gram features for the block
    """
    blk_b, seq, cin = x_ref.shape
    rows = blk_b * seq

    # masked_tensor, then flatten batch*seq into the matmul M dimension and go
    # bf16 for the MXU (accumulation stays f32).
    x = x_ref[...] * m_ref[...]                                    # (B, S, Cin)
    x2 = x.reshape(rows, cin).astype(jnp.bfloat16)                 # (R, Cin)

    # One fused matmul covering every tap of every kernel size.
    z = jnp.dot(x2, w_ref[...], preferred_element_type=jnp.float32)  # (R, N) f32

    # Position of each flattened row inside its own sequence, used to zero the
    # rolled taps at sequence boundaries (conv 'same' zero padding).
    t = lax.broadcasted_iota(jnp.int32, (rows, coutp), 0) % seq

    bias = b_ref[...]                                              # (1, Cout)
    col = 0
    pooled = []
    for j, ks in enumerate(kernel_sizes):
        pad = (ks - 1) // 2
        acc = jnp.zeros((rows, coutp), jnp.float32)
        for k in range(ks):
            d = k - pad                        # input offset of this tap
            zk = z[:, col:col + coutp]         # (R, coutp) tap contribution
            col += coutp
            if d != 0:
                # Row r needs z[r + d]  (np.roll convention -> shift = -d, mod R).
                zk = pltpu.roll(zk, (-d) % rows, 0)
                valid = jnp.logical_and(t + d >= 0, t + d < seq)
                zk = jnp.where(valid, zk, 0.0)
            acc = acc + zk
        # Conv bias + ReLU, then MaxPool1d(seq_len) within each sequence.
        acc = jnp.maximum(acc + bias[:, j * coutp:(j + 1) * coutp], 0.0)
        pooled.append(jnp.max(acc.reshape(blk_b, seq, coutp), axis=1))  # (B, coutp)

    # Single lane-dense store of the whole block's features.
    o_ref[0] = jnp.concatenate(pooled, axis=-1)                    # (B, Cout)


def _pick_block_b(bz, seq_len, target_rows=256):
    """Sequences per grid step: aim for ~256 matmul rows (full v6e/v7x MXU pass,
    2x a v5e pass) while keeping >=2 grid steps when possible so v7x's two
    TensorCores and the software pipeline both have work.  Blocks stay far
    below the v7x 64 MiB VMEM budget at these sizes."""
    b = max(1, min(bz, max(1, target_rows // max(seq_len, 1))))
    while b > 1 and (bz + b - 1) // b < 2:
        b //= 2
    return b


@functools.partial(jax.jit, static_argnames=("kernel_sizes", "block_b"))
def ngram_feat(inputs, input_masks, conv_weights, conv_biases, *,
               kernel_sizes, block_b=None):
    """NgramFeat(arch='CNN') forward.

    inputs:       [bz, seq_len, in_features]  float32
    input_masks:  [bz, seq_len]               0/1 (any dtype)
    conv_weights: tuple of [out_per_kz, in_features, kz]  (PyTorch Conv1d layout)
    conv_biases:  tuple of [out_per_kz]
    Returns [bz, out_features]  (MaxPool1d's trailing length-1 dim squeezed).
    """
    bz, seq_len, cin = inputs.shape
    coutp = conv_weights[0].shape[0]
    cout = coutp * len(kernel_sizes)
    assert seq_len % 8 == 0, "seq_len must be a multiple of 8 (sublane tiling)"
    for w, ks in zip(conv_weights, kernel_sizes):
        assert w.shape == (coutp, cin, ks) and ks % 2 == 1

    # Fused RHS slab: one (Cin, coutp) column block per tap, tap-major per
    # kernel-size group -> a single (Cin, sum(kz)*coutp) matmul RHS in bf16.
    taps = []
    for w, ks in zip(conv_weights, kernel_sizes):
        for k in range(ks):
            taps.append(jnp.transpose(w[:, :, k]))                 # (Cin, coutp)
    w_slab = jnp.concatenate(taps, axis=1).astype(jnp.bfloat16)    # (Cin, N)
    n_cols = w_slab.shape[1]
    bias = jnp.concatenate(conv_biases).reshape(1, cout).astype(jnp.float32)

    if block_b is None:
        block_b = _pick_block_b(bz, seq_len)
    n_blk = pl.cdiv(bz, block_b)
    bz_pad = n_blk * block_b

    x = inputs.astype(jnp.float32)
    m = input_masks.astype(jnp.float32).reshape(bz, seq_len, 1)
    if bz_pad != bz:
        x = jnp.pad(x, ((0, bz_pad - bz), (0, 0), (0, 0)))
        m = jnp.pad(m, ((0, bz_pad - bz), (0, 0), (0, 0)))

    kernel = functools.partial(_ngram_kernel,
                               kernel_sizes=tuple(kernel_sizes), coutp=coutp)

    out = pl.pallas_call(
        kernel,
        out_shape=jax.ShapeDtypeStruct((n_blk, block_b, cout), jnp.float32),
        grid_spec=pltpu.PrefetchScalarGridSpec(
            num_scalar_prefetch=0,
            grid=(n_blk,),
            in_specs=[
                pl.BlockSpec((block_b, seq_len, cin), lambda i: (i, 0, 0)),
                pl.BlockSpec((block_b, seq_len, 1), lambda i: (i, 0, 0)),
                pl.BlockSpec((cin, n_cols), lambda i: (0, 0)),
                pl.BlockSpec((1, cout), lambda i: (0, 0)),
            ],
            out_specs=pl.BlockSpec((1, block_b, cout), lambda i: (i, 0, 0)),
        ),
        compiler_params=pltpu.CompilerParams(
            dimension_semantics=("parallel",)),
    )(x, m, w_slab, bias)

    return out.reshape(bz_pad, cout)[:bz]


def _reference(inputs, input_masks, conv_weights, conv_biases, kernel_sizes):
    """Pure-JAX/XLA reference for NgramFeat(arch='CNN').forward (f32)."""
    x = inputs * input_masks[..., None].astype(inputs.dtype)      # masked_tensor
    x_ncl = jnp.transpose(x, (0, 2, 1))                           # N, C, L
    feats = []
    for w, b, ks in zip(conv_weights, conv_biases, kernel_sizes):
        pad = (ks - 1) // 2
        y = lax.conv_general_dilated(
            x_ncl, w, window_strides=(1,), padding=[(pad, pad)],
            dimension_numbers=("NCH", "OIH", "NCH"))
        feats.append(y + b[None, :, None])
    y = jnp.concatenate(feats, axis=1)                            # MyConv1d channel concat
    y = jnp.maximum(y, 0.0)                                       # ReLU
    return jnp.max(y, axis=-1)                                    # MaxPool1d(seq_len)


if __name__ == "__main__":
    bz, seq_len = 8, 16
    in_features, out_features = 96, 128
    kernel_sizes = (3, 5)                       # MyConv1d with two kernel sizes
    coutp = out_features // len(kernel_sizes)

    key = jax.random.PRNGKey(0)
    keys = jax.random.split(key, 2 + 2 * len(kernel_sizes))
    inputs = jax.random.normal(keys[0], (bz, seq_len, in_features), jnp.float32)
    input_masks = (jax.random.uniform(keys[1], (bz, seq_len)) > 0.25
                   ).astype(jnp.float32)

    conv_weights, conv_biases = [], []
    for j, ks in enumerate(kernel_sizes):
        bound = 1.0 / (in_features * ks) ** 0.5    # Conv1d-style init range
        conv_weights.append(jax.random.uniform(
            keys[2 + 2 * j], (coutp, in_features, ks), jnp.float32, -bound, bound))
        conv_biases.append(jax.random.uniform(
            keys[3 + 2 * j], (coutp,), jnp.float32, -bound, bound))
    conv_weights = tuple(conv_weights)
    conv_biases = tuple(conv_biases)

    out = ngram_feat(inputs, input_masks, conv_weights, conv_biases,
                     kernel_sizes=kernel_sizes)
    jax.block_until_ready(out)

    ref = _reference(inputs, input_masks, conv_weights, conv_biases, kernel_sizes)
    assert out.shape == (bz, out_features), out.shape
    max_err = float(jnp.max(jnp.abs(out - ref)))
    # bf16 matmul operands with f32 accumulation vs an all-f32 reference.
    assert jnp.allclose(out, ref, atol=5e-2, rtol=5e-2), f"mismatch, max err {max_err}"
    print("KERNEL_OK")
</pallas_src>

<mosaic_0001>
module attributes {stable_mosaic.version = 11 : i64} {
  func.func @_ngram_kernel(%arg0: i32, %arg1: memref<4x16x96xf32, #tpu.memory_space<vmem>>, %arg2: memref<4x16x1xf32, #tpu.memory_space<vmem>>, %arg3: memref<96x512xbf16, #tpu.memory_space<vmem>>, %arg4: memref<1x128xf32, #tpu.memory_space<vmem>>, %arg5: memref<1x4x128xf32, #tpu.memory_space<vmem>>) attributes {dimension_semantics = [#tpu.dimension_semantics<parallel>], iteration_bounds = array<i64: 2>, scalar_prefetch = 0 : i64, scratch_operands = 0 : i64, tpu.core_type = #tpu.core_type<tc>, window_params = [{transform_indices = @transform_0, window_bounds = array<i64: 4, 16, 96>}, {transform_indices = @transform_1, window_bounds = array<i64: 4, 16, 1>}, {pipeline_mode = #tpu.pipeline_mode<synchronous>, transform_indices = @transform_2, window_bounds = array<i64: 96, 512>}, {pipeline_mode = #tpu.pipeline_mode<synchronous>, transform_indices = @transform_3, window_bounds = array<i64: 1, 128>}, {transform_indices = @transform_4, window_bounds = array<i64: 1, 4, 128>}]} {
    %c0 = arith.constant 0 : index
    %c0_0 = arith.constant 0 : index
    %c0_1 = arith.constant 0 : index
    %0 = vector.load %arg1[%c0, %c0_0, %c0_1] : memref<4x16x96xf32, #tpu.memory_space<vmem>>, vector<4x16x96xf32>
    %c0_2 = arith.constant 0 : index
    %c0_3 = arith.constant 0 : index
    %c0_4 = arith.constant 0 : index
    %1 = vector.load %arg2[%c0_2, %c0_3, %c0_4] : memref<4x16x1xf32, #tpu.memory_space<vmem>>, vector<4x16x1xf32>
    %2 = vector.broadcast %1 : vector<4x16x1xf32> to vector<4x16x96xf32>
    %3 = arith.mulf %0, %2 : vector<4x16x96xf32>
    %4 = vector.shape_cast %3 : vector<4x16x96xf32> to vector<64x96xf32>
    %5 = arith.truncf %4 : vector<64x96xf32> to vector<64x96xbf16>
    %c0_5 = arith.constant 0 : index
    %c0_6 = arith.constant 0 : index
    %6 = vector.load %arg3[%c0_5, %c0_6] : memref<96x512xbf16, #tpu.memory_space<vmem>>, vector<96x512xbf16>
    %cst = arith.constant dense<0.000000e+00> : vector<64x512xf32>
    %7 = tpu.matmul %5, %6, %cst {dimension_numbers = #tpu.dot_dimension_numbers<[1], [0], [0], [1], [0, 0, 1, 1], [], []>} : vector<64x96xbf16>, vector<96x512xbf16>, vector<64x512xf32> -> vector<64x512xf32>
    %8 = tpu.iota {dimensions = array<i32: 0>} : vector<64x64xi32>
    %c16_i32 = arith.constant 16 : i32
    %c0_i32 = arith.constant 0 : i32
    %9 = arith.cmpi eq, %c16_i32, %c0_i32 : i32
    %c1_i32 = arith.constant 1 : i32
    %10 = arith.select %9, %c1_i32, %c16_i32 : i32
    %11 = vector.broadcast %10 : i32 to vector<64x64xi32>
    %12 = arith.remsi %8, %11 : vector<64x64xi32>
    %c0_i32_7 = arith.constant 0 : i32
    %13 = vector.broadcast %c0_i32_7 : i32 to vector<64x64xi32>
    %14 = arith.cmpi ne, %12, %13 : vector<64x64xi32>
    %c0_i32_8 = arith.constant 0 : i32
    %15 = vector.broadcast %c0_i32_8 : i32 to vector<64x64xi32>
    %16 = arith.cmpi slt, %12, %15 : vector<64x64xi32>
    %c0_i32_9 = arith.constant 0 : i32
    %17 = arith.cmpi slt, %10, %c0_i32_9 : i32
    %18 = vector.broadcast %17 : i1 to vector<64x64xi1>
    %19 = vector.broadcast %18 : vector<64x64xi1> to vector<64x64xi1>
    %20 = arith.xori %16, %19 : vector<64x64xi1>
    %21 = arith.andi %20, %14 : vector<64x64xi1>
    %22 = vector.broadcast %10 : i32 to vector<64x64xi32>
    %23 = arith.addi %12, %22 : vector<64x64xi32>
    %24 = arith.select %21, %23, %12 : vector<64x64xi1>, vector<64x64xi32>
    %c0_10 = arith.constant 0 : index
    %c0_11 = arith.constant 0 : index
    %25 = vector.load %arg4[%c0_10, %c0_11] : memref<1x128xf32, #tpu.memory_space<vmem>>, vector<1x128xf32>
    %cst_12 = arith.constant 0.000000e+00 : f32
    %26 = vector.broadcast %cst_12 : f32 to vector<64x64xf32>
    %27 = vector.extract_strided_slice %7 {offsets = [0, 0], sizes = [64, 64], strides = [1, 1]} : vector<64x512xf32> to vector<64x64xf32>
    %c1_i32_13 = arith.constant 1 : i32
    %28 = tpu.dynamic_rotate %27 by %c1_i32_13 dim 0 : vector<64x64xf32>, i32 -> vector<64x64xf32>
    %c-1_i32 = arith.constant -1 : i32
    %29 = vector.broadcast %c-1_i32 : i32 to vector<64x64xi32>
    %30 = arith.addi %24, %29 : vector<64x64xi32>
    %c0_i32_14 = arith.constant 0 : i32
    %31 = vector.broadcast %c0_i32_14 : i32 to vector<64x64xi32>
    %32 = arith.cmpi sge, %30, %31 : vector<64x64xi32>
    %c-1_i32_15 = arith.constant -1 : i32
    %33 = vector.broadcast %c-1_i32_15 : i32 to vector<64x64xi32>
    %34 = arith.addi %24, %33 : vector<64x64xi32>
    %c16_i32_16 = arith.constant 16 : i32
    %35 = vector.broadcast %c16_i32_16 : i32 to vector<64x64xi32>
    %36 = arith.cmpi slt, %34, %35 : vector<64x64xi32>
    %37 = arith.andi %32, %36 : vector<64x64xi1>
    %cst_17 = arith.constant 0.000000e+00 : f32
    %38 = vector.broadcast %cst_17 : f32 to vector<64x64xf32>
    %39 = arith.select %37, %28, %38 : vector<64x64xi1>, vector<64x64xf32>
    %40 = arith.addf %26, %39 : vector<64x64xf32>
    %41 = vector.extract_strided_slice %7 {offsets = [0, 64], sizes = [64, 64], strides = [1, 1]} : vector<64x512xf32> to vector<64x64xf32>
    %42 = arith.addf %40, %41 : vector<64x64xf32>
    %43 = vector.extract_strided_slice %7 {offsets = [0, 128], sizes = [64, 64], strides = [1, 1]} : vector<64x512xf32> to vector<64x64xf32>
    %c63_i32 = arith.constant 63 : i32
    %44 = tpu.dynamic_rotate %43 by %c63_i32 dim 0 : vector<64x64xf32>, i32 -> vector<64x64xf32>
    %c1_i32_18 = arith.constant 1 : i32
    %45 = vector.broadcast %c1_i32_18 : i32 to vector<64x64xi32>
    %46 = arith.addi %24, %45 : vector<64x64xi32>
    %c0_i32_19 = arith.constant 0 : i32
    %47 = vector.broadcast %c0_i32_19 : i32 to vector<64x64xi32>
    %48 = arith.cmpi sge, %46, %47 : vector<64x64xi32>
    %c1_i32_20 = arith.constant 1 : i32
    %49 = vector.broadcast %c1_i32_20 : i32 to vector<64x64xi32>
    %50 = arith.addi %24, %49 : vector<64x64xi32>
    %c16_i32_21 = arith.constant 16 : i32
    %51 = vector.broadcast %c16_i32_21 : i32 to vector<64x64xi32>
    %52 = arith.cmpi slt, %50, %51 : vector<64x64xi32>
    %53 = arith.andi %48, %52 : vector<64x64xi1>
    %cst_22 = arith.constant 0.000000e+00 : f32
    %54 = vector.broadcast %cst_22 : f32 to vector<64x64xf32>
    %55 = arith.select %53, %44, %54 : vector<64x64xi1>, vector<64x64xf32>
    %56 = arith.addf %42, %55 : vector<64x64xf32>
    %57 = vector.extract_strided_slice %25 {offsets = [0, 0], sizes = [1, 64], strides = [1, 1]} : vector<1x128xf32> to vector<1x64xf32>
    %58 = vector.broadcast %57 : vector<1x64xf32> to vector<64x64xf32>
    %59 = arith.addf %56, %58 : vector<64x64xf32>
    %cst_23 = arith.constant 0.000000e+00 : f32
    %60 = vector.broadcast %cst_23 : f32 to vector<64x64xf32>
    %61 = arith.maximumf %59, %60 : vector<64x64xf32>
    %62 = vector.shape_cast %61 : vector<64x64xf32> to vector<4x16x64xf32>
    %cst_24 = arith.constant dense<0xFF800000> : vector<4x64xf32>
    %63 = vector.multi_reduction <maximumf>, %62, %cst_24 [1] : vector<4x16x64xf32> to vector<4x64xf32>
    %cst_25 = arith.constant 0.000000e+00 : f32
    %64 = vector.broadcast %cst_25 : f32 to vector<64x64xf32>
    %65 = vector.extract_strided_slice %7 {offsets = [0, 192], sizes = [64, 64], strides = [1, 1]} : vector<64x512xf32> to vector<64x64xf32>
    %c2_i32 = arith.constant 2 : i32
    %66 = tpu.dynamic_rotate %65 by %c2_i32 dim 0 : vector<64x64xf32>, i32 -> vector<64x64xf32>
    %c-2_i32 = arith.constant -2 : i32
    %67 = vector.broadcast %c-2_i32 : i32 to vector<64x64xi32>
    %68 = arith.addi %24, %67 : vector<64x64xi32>
    %c0_i32_26 = arith.constant 0 : i32
    %69 = vector.broadcast %c0_i32_26 : i32 to vector<64x64xi32>
    %70 = arith.cmpi sge, %68, %69 : vector<64x64xi32>
    %c-2_i32_27 = arith.constant -2 : i32
    %71 = vector.broadcast %c-2_i32_27 : i32 to vector<64x64xi32>
    %72 = arith.addi %24, %71 : vector<64x64xi32>
    %c16_i32_28 = arith.constant 16 : i32
    %73 = vector.broadcast %c16_i32_28 : i32 to vector<64x64xi32>
    %74 = arith.cmpi slt, %72, %73 : vector<64x64xi32>
    %75 = arith.andi %70, %74 : vector<64x64xi1>
    %cst_29 = arith.constant 0.000000e+00 : f32
    %76 = vector.broadcast %cst_29 : f32 to vector<64x64xf32>
    %77 = arith.select %75, %66, %76 : vector<64x64xi1>, vector<64x64xf32>
    %78 = arith.addf %64, %77 : vector<64x64xf32>
    %79 = vector.extract_strided_slice %7 {offsets = [0, 256], sizes = [64, 64], strides = [1, 1]} : vector<64x512xf32> to vector<64x64xf32>
    %c1_i32_30 = arith.constant 1 : i32
    %80 = tpu.dynamic_rotate %79 by %c1_i32_30 dim 0 : vector<64x64xf32>, i32 -> vector<64x64xf32>
    %c-1_i32_31 = arith.constant -1 : i32
    %81 = vector.broadcast %c-1_i32_31 : i32 to vector<64x64xi32>
    %82 = arith.addi %24, %81 : vector<64x64xi32>
    %c0_i32_32 = arith.constant 0 : i32
    %83 = vector.broadcast %c0_i32_32 : i32 to vector<64x64xi32>
    %84 = arith.cmpi sge, %82, %83 : vector<64x64xi32>
    %c-1_i32_33 = arith.constant -1 : i32
    %85 = vector.broadcast %c-1_i32_33 : i32 to vector<64x64xi32>
    %86 = arith.addi %24, %85 : vector<64x64xi32>
    %c16_i32_34 = arith.constant 16 : i32
    %87 = vector.broadcast %c16_i32_34 : i32 to vector<64x64xi32>
    %88 = arith.cmpi slt, %86, %87 : vector<64x64xi32>
    %89 = arith.andi %84, %88 : vector<64x64xi1>
    %cst_35 = arith.constant 0.000000e+00 : f32
    %90 = vector.broadcast %cst_35 : f32 to vector<64x64xf32>
    %91 = arith.select %89, %80, %90 : vector<64x64xi1>, vector<64x64xf32>
    %92 = arith.addf %78, %91 : vector<64x64xf32>
    %93 = vector.extract_strided_slice %7 {offsets = [0, 320], sizes = [64, 64], strides = [1, 1]} : vector<64x512xf32> to vector<64x64xf32>
    %94 = arith.addf %92, %93 : vector<64x64xf32>
    %95 = vector.extract_strided_slice %7 {offsets = [0, 384], sizes = [64, 64], strides = [1, 1]} : vector<64x512xf32> to vector<64x64xf32>
    %c63_i32_36 = arith.constant 63 : i32
    %96 = tpu.dynamic_rotate %95 by %c63_i32_36 dim 0 : vector<64x64xf32>, i32 -> vector<64x64xf32>
    %c1_i32_37 = arith.constant 1 : i32
    %97 = vector.broadcast %c1_i32_37 : i32 to vector<64x64xi32>
    %98 = arith.addi %24, %97 : vector<64x64xi32>
    %c0_i32_38 = arith.constant 0 : i32
    %99 = vector.broadcast %c0_i32_38 : i32 to vector<64x64xi32>
    %100 = arith.cmpi sge, %98, %99 : vector<64x64xi32>
    %c1_i32_39 = arith.constant 1 : i32
    %101 = vector.broadcast %c1_i32_39 : i32 to vector<64x64xi32>
    %102 = arith.addi %24, %101 : vector<64x64xi32>
    %c16_i32_40 = arith.constant 16 : i32
    %103 = vector.broadcast %c16_i32_40 : i32 to vector<64x64xi32>
    %104 = arith.cmpi slt, %102, %103 : vector<64x64xi32>
    %105 = arith.andi %100, %104 : vector<64x64xi1>
    %cst_41 = arith.constant 0.000000e+00 : f32
    %106 = vector.broadcast %cst_41 : f32 to vector<64x64xf32>
    %107 = arith.select %105, %96, %106 : vector<64x64xi1>, vector<64x64xf32>
    %108 = arith.addf %94, %107 : vector<64x64xf32>
    %109 = vector.extract_strided_slice %7 {offsets = [0, 448], sizes = [64, 64], strides = [1, 1]} : vector<64x512xf32> to vector<64x64xf32>
    %c62_i32 = arith.constant 62 : i32
    %110 = tpu.dynamic_rotate %109 by %c62_i32 dim 0 : vector<64x64xf32>, i32 -> vector<64x64xf32>
    %c2_i32_42 = arith.constant 2 : i32
    %111 = vector.broadcast %c2_i32_42 : i32 to vector<64x64xi32>
    %112 = arith.addi %24, %111 : vector<64x64xi32>
    %c0_i32_43 = arith.constant 0 : i32
    %113 = vector.broadcast %c0_i32_43 : i32 to vector<64x64xi32>
    %114 = arith.cmpi sge, %112, %113 : vector<64x64xi32>
    %c2_i32_44 = arith.constant 2 : i32
    %115 = vector.broadcast %c2_i32_44 : i32 to vector<64x64xi32>
    %116 = arith.addi %24, %115 : vector<64x64xi32>
    %c16_i32_45 = arith.constant 16 : i32
    %117 = vector.broadcast %c16_i32_45 : i32 to vector<64x64xi32>
    %118 = arith.cmpi slt, %116, %117 : vector<64x64xi32>
    %119 = arith.andi %114, %118 : vector<64x64xi1>
    %cst_46 = arith.constant 0.000000e+00 : f32
    %120 = vector.broadcast %cst_46 : f32 to vector<64x64xf32>
    %121 = arith.select %119, %110, %120 : vector<64x64xi1>, vector<64x64xf32>
    %122 = arith.addf %108, %121 : vector<64x64xf32>
    %123 = vector.extract_strided_slice %25 {offsets = [0, 64], sizes = [1, 64], strides = [1, 1]} : vector<1x128xf32> to vector<1x64xf32>
    %124 = vector.broadcast %123 : vector<1x64xf32> to vector<64x64xf32>
    %125 = arith.addf %122, %124 : vector<64x64xf32>
    %cst_47 = arith.constant 0.000000e+00 : f32
    %126 = vector.broadcast %cst_47 : f32 to vector<64x64xf32>
    %127 = arith.maximumf %125, %126 : vector<64x64xf32>
    %128 = vector.shape_cast %127 : vector<64x64xf32> to vector<4x16x64xf32>
    %cst_48 = arith.constant dense<0xFF800000> : vector<4x64xf32>
    %129 = vector.multi_reduction <maximumf>, %128, %cst_48 [1] : vector<4x16x64xf32> to vector<4x64xf32>
    %130 = tpu.concatenate %63, %129 in 1 : vector<4x64xf32>, vector<4x64xf32> -> vector<4x128xf32>
    %c0_49 = arith.constant 0 : index
    %c0_50 = arith.constant 0 : index
    %c0_51 = arith.constant 0 : index
    %131 = vector.load %arg5[%c0_49, %c0_50, %c0_51] : memref<1x4x128xf32, #tpu.memory_space<vmem>>, vector<1x4x128xf32>
    %132 = vector.shape_cast %131 : vector<1x4x128xf32> to vector<4x128xf32>
    %133 = vector.shape_cast %130 : vector<4x128xf32> to vector<1x4x128xf32>
    tpu.vector_store %arg5[%c0_49, %c0_50, %c0_51], %133 {strides = array<i32>} : memref<1x4x128xf32, #tpu.memory_space<vmem>>, vector<1x4x128xf32>,
    return
  }
  func.func @transform_0(%arg0: i32) -> (i32, i32, i32) {
    %c0_i32 = arith.constant 0 : i32
    %c0_i32_0 = arith.constant 0 : i32
    %c0_i32_1 = arith.constant 0 : i32
    return %arg0, %c0_i32, %c0_i32_0 : i32, i32, i32
  }
  func.func @transform_1(%arg0: i32) -> (i32, i32, i32) {
    %c0_i32 = arith.constant 0 : i32
    %c0_i32_0 = arith.constant 0 : i32
    %c0_i32_1 = arith.constant 0 : i32
    return %arg0, %c0_i32, %c0_i32_0 : i32, i32, i32
  }
  func.func @transform_2(%arg0: i32) -> (i32, i32) {
    %c0_i32 = arith.constant 0 : i32
    %c0_i32_0 = arith.constant 0 : i32
    %c0_i32_1 = arith.constant 0 : i32
    return %c0_i32, %c0_i32_0 : i32, i32
  }
  func.func @transform_3(%arg0: i32) -> (i32, i32) {
    %c0_i32 = arith.constant 0 : i32
    %c0_i32_0 = arith.constant 0 : i32
    %c0_i32_1 = arith.constant 0 : i32
    return %c0_i32, %c0_i32_0 : i32, i32
  }
  func.func @transform_4(%arg0: i32) -> (i32, i32, i32) {
    %c0_i32 = arith.constant 0 : i32
    %c0_i32_0 = arith.constant 0 : i32
    %c0_i32_1 = arith.constant 0 : i32
    return %arg0, %c0_i32, %c0_i32_0 : i32, i32, i32
  }
}

</mosaic_0001>

<bundles_post_ra>
// kernel: ngram_feat.1
= control target key start
LH: loop header
LB: loop body
LE: loop exit
PB: predicated region body
PF: predicated region fallthrough
CT: control target
= control target key end

     0   :  { %9 = vsyncpa [#allocation3], 0  ;;  %s2316_s0 = inlined_call_operand.vmem [shape: f32[8,16,96], index: 0, kind: input, shape index: {}]   ;;  %s2317_s1 = inlined_call_operand.vmem [shape: f32[8,16,1], index: 1, kind: input, shape index: {}]   ;;  %s2318_s2 = inlined_call_operand.vmem [shape: bf16[96,512], index: 2, kind: input, shape index: {}]   ;;  %s2319_s3 = inlined_call_operand.vmem [shape: f32[1,128], index: 3, kind: input, shape index: {}]   ;;  %s2320_s4 = inlined_call_operand.hbm [shape: f32[2,4,128], index: 4, kind: output, shape index: {}]  }
   0x1   :  { %11 = vsyncpa [#allocation3 + $0x1], 0  ;;  %s1615_s15 = smov 0   ;;  %s1617_s16 = smov 0  }
   0x2   :  { %s1619_s17 = smov 0   ;;  %s1621_s18 = smov 0  }
   0x3 LB: > { %s1636_s19 = sadd.s32 4294967295, %s1585_s18   ;;  %s1394_s20 = sadd.s32 4294967294, %s1585_s18   ;;  %s1585_s18 = sphi %s1621_s18, %s2370_s18   ;;  %s1581_s17 = sphi %s1619_s17, %s2369_s17   ;;  %s1577_s16 = sphi %s1617_s16, %s2368_s16   ;;  %s1573_s15 = sphi %s1615_s15, %s2367_s15  }
   0x4   : > { %s1640_s21 = sadd.s32 1, %s1585_s18   ;;  %s118_s22 = sadd.s32 1, %s1581_s17 }
   0x5   : > { %s115_s23 = ssub.s32 %s1585_s18, %s1640_s21  ;;  %p128_p0 = scmp.ne.s32.totalorder %s1581_s17, %s1577_s16 }
   0x6   : > { %p116_p1 = scmp.eq.s32.totalorder %s115_s23, 0  ;;  %p129_p2 = scmp.eq.s32.totalorder %s1636_s19, 1 }
   0x7   : > { %p134_p3 = scmp.ne.s32.totalorder %s1577_s16, %s1573_s15  ;;  %p135_p4 = scmp.eq.s32.totalorder %s1394_s20, 1 }
   0x8   : > { %s1651_s24 = scalar_select %p116_p1, %s1581_s17, %s118_s22  }
   0x9   : > { %p1653_p5 = por %p129_p2, %p128_p0  ;;  %p1657_p6 = por %p135_p4, %p134_p3 }
   0xa   : > { %p1397_p7 = scmp.ge.s32.totalorder %s1585_s18, 1  ;;  %p179_p8 = scmp.lt.s32.totalorder %s1585_s18, 3 }
   0xc   : > { %p180_p9 = pnand %p1397_p7, %p179_p8 }
   0xe   : > { %183 = sbr.rel (%p180_p9) target bundleno = 709 (0x2c5), region = 36 }
  0x15   : > { %s1399_s27 = sshll.u32 %s1636_s19, 2  ;;  %v1487_v0 = vld [vmem:[%s2318_s2 + $0x4] ss:$16 sps:$4 sm:$0xff]   ;;  %v1587_v1 = vmov 0   ;;  %v1489_v2 = vld [vmem:[%s2318_s2 + $0xc] ss:$16 sps:$4 sm:$0xff]   ;;  %v598_v61 = vlaneseq }
  0x16   : > { %1486 = vset.pattern.permute.xlu1 %v1587_v1  ;;  %1485 = vset.pattern.permute.xlu0 %v1587_v1  ;;  %p213_p10 = scmp.lt.s32.totalorder %s1399_s27, 7  ;;  %v1491_v3 = vld [vmem:[%s2318_s2] ss:$16 sps:$4 sm:$0xff]   ;;  %v1492_v4 = vld [vmem:[%s2318_s2 + $0x8] ss:$16 sps:$4 sm:$0xff]   ;;  %vm439_vm0 = vcmask 785408  }
  0x17   : > { %452 = vmatprep.subr.bf16.mxu0 %v1487_v0  ;;  %484 = vmatprep.mubr.bf16.mxu0 %v1587_v1  ;;  %v1493_v5 = vld [vmem:[%s2318_s2 + $0x24] ss:$16 sps:$4 sm:$0xff]   ;;  %v1495_v6 = vld [vmem:[%s2318_s2 + $0x2c] ss:$16 sps:$4 sm:$0xff]   ;;  %v1497_v7 = vld [vmem:[%s2318_s2 + $0x20] ss:$16 sps:$4 sm:$0xff]  }
  0x18   : > { %s2372_s27 = smov (!%p213_p10, %s1399_s27), 7  ;;  %525 = vmatprep.subr.bf16.mxu1 %v1489_v2  ;;  %557 = vmatprep.mubr.bf16.mxu1 %v1587_v1  ;;  %v1498_v8 = vld [vmem:[%s2318_s2 + $0x28] ss:$16 sps:$4 sm:$0xff]   ;;  %v1499_v9 = vld [vmem:[%s2318_s2 + $0x44] ss:$16 sps:$4 sm:$0xff]   ;;  %v1787_v62 = vshrl.u32 %v598_v61, 7 }
  0x19   : > { %453 = vmatpush1.bf16.msra.mxu0 %v1491_v3  ;;  %526 = vmatpush1.bf16.msra.mxu1 %v1492_v4  ;;  %s1442_s22 = sshll.u32 %s2372_s27, 4  ;;  %v1501_v14 = vld [vmem:[%s2318_s2 + $0x4c] ss:$16 sps:$4 sm:$0xff]   ;;  %v1503_v15 = vld [vmem:[%s2318_s2 + $0x40] ss:$16 sps:$4 sm:$0xff]   ;;  %s1588_s27 = smov 64  }
  0x1a   : > { %454 = vmatprep.subr.bf16.mxu0 %v1493_v5  ;;  %s1700_s5 = scalar_lea.vmem %s2317_s1, %s1442_s22  ;;  %527 = vmatprep.subr.bf16.mxu1 %v1495_v6  ;;  %v1504_v16 = vld [vmem:[%s2318_s2 + $0x48] ss:$16 sps:$4 sm:$0xff]   ;;  %v1505_v17 = vld [vmem:[%s2318_s2 + $0x64] ss:$16 sps:$4 sm:$0xff]   ;;  %v1507_v19 = vld [vmem:[%s2318_s2 + $0x6c] ss:$16 sps:$4 sm:$0xff]   ;;  %s1763_s11 = scalar_lea.vmem %s2316_s0, %s1442_s22 }
  0x1b   : > { %v237_v10 = vld [vmem:[%s1700_s5 + $0x10] sm:$0xff]  ;;  %v235_v11 = vld [vmem:[%s1700_s5] sm:$0xff]  ;;  %v238_v12 = vld [vmem:[%s1700_s5 + $0x18] sm:$0xff]  ;;  %v1790_v63 = vadd.s32 16, %v1787_v62  ;;  %v1793_v0 = vadd.s32 8, %v1787_v62  ;;  %vm712_vm1 = vcmp.lt.s32.totalorder %v1787_v62, 1 }
  0x1c   : > { %255 = vperm.xlu1 %1486, %v237_v10   ;;  %245 = vperm.xlu0 %1485, %v235_v11   ;;  %v236_v13 = vld [vmem:[%s1700_s5 + $0x8] sm:$0xff]  ;;  %v239_v20 = vld [vmem:[%s1700_s5 + $0x20] sm:$0xff]  ;;  %v242_v25 = vld [vmem:[%s1700_s5 + $0x38] sm:$0xff]  ;;  %vm817_vm2 = vcmp.lt.s32.totalorder %v1787_v62, 7  ;;  %v1932_v61 = vadd.s32 56, %v1787_v62  ;;  %vm973_vm11 = vcmp.lt.s32.totalorder %v1787_v62, 2 }
  0x1d   : > { %455 = vmatpush1.bf16.msra.mxu0 %v1497_v7  ;;  %528 = vmatpush1.bf16.msra.mxu1 %v1498_v8  ;;  %v240_v18 = vld [vmem:[%s1700_s5 + $0x28] sm:$0xff]  ;;  %v1509_v21 = vld [vmem:[%s2318_s2 + $0x60] ss:$16 sps:$4 sm:$0xff]   ;;  %v1511_v23 = vld [vmem:[%s2318_s2 + $0x84] ss:$16 sps:$4 sm:$0xff]   ;;  %v2324_v5 = vand.u32 15, %v1790_v63 }
  0x1e   : > { %456 = vmatprep.subr.bf16.mxu0 %v1499_v9  ;;  %529 = vmatprep.subr.bf16.mxu1 %v1501_v14  ;;  %v1510_v22 = vld [vmem:[%s2318_s2 + $0x68] ss:$16 sps:$4 sm:$0xff]   ;;  %v1513_v24 = vld [vmem:[%s2318_s2 + $0x8c] ss:$16 sps:$4 sm:$0xff]   ;;  %v241_v26 = vld [vmem:[%s1700_s5 + $0x30] sm:$0xff]  ;;  %v2322_v8 = vand.u32 15, %v1793_v0 }
  0x1f   : > { %v1515_v27 = vld [vmem:[%s2318_s2 + $0x80] ss:$16 sps:$4 sm:$0xff]   ;;  %v1516_v28 = vld [vmem:[%s2318_s2 + $0x88] ss:$16 sps:$4 sm:$0xff]   ;;  %v1517_v29 = vld [vmem:[%s2318_s2 + $0xa4] ss:$16 sps:$4 sm:$0xff]  }
  0x20   : > { %260 = vperm.xlu1 %1486, %v238_v12   ;;  %250 = vperm.xlu0 %1485, %v236_v13   ;;  %v1519_v30 = vld [vmem:[%s2318_s2 + $0xac] ss:$16 sps:$4 sm:$0xff]   ;;  %v1521_v31 = vld [vmem:[%s2318_s2 + $0xa0] ss:$16 sps:$4 sm:$0xff]   ;;  %v1522_v32 = vld [vmem:[%s2318_s2 + $0xa8] ss:$16 sps:$4 sm:$0xff]  }
  0x21   : > { %457 = vmatpush1.bf16.msra.mxu0 %v1503_v15  ;;  %530 = vmatpush1.bf16.msra.mxu1 %v1504_v16  ;;  %v227_v34 = vld [vmem:[%s1763_s11] sm:$0xff]  ;;  %v228_v35 = vld [vmem:[%s1763_s11 + $0x8] sm:$0xff]  ;;  %v229_v41 = vld [vmem:[%s1763_s11 + $0x10] sm:$0xff]  ;;  %v1812_v9 = vadd.s32 32, %v1787_v62  ;;  %vm1174_vm14 = vcmp.lt.s32.totalorder %v1787_v62, 6  ;;  %s209_s13 = sand.u32 1, %s1577_s16  }
  0x22   : > { %458 = vmatprep.subr.bf16.mxu0 %v1505_v17  ;;  %531 = vmatprep.subr.bf16.mxu1 %v1507_v19  ;;  %v230_v42 = vld [vmem:[%s1763_s11 + $0x18] sm:$0xff]  ;;  %v232_v48 = vld [vmem:[%s1763_s11 + $0x28] sm:$0xff]  ;;  %v231_v50 = vld [vmem:[%s1763_s11 + $0x20] sm:$0xff]  ;;  %s1398_s14 = sshll.u32 %s209_s13, 2  ;;  %s1439_s20 = sshll.u32 %s1636_s19, 6 }
  0x23   : > { %v234_v55 = vld [vmem:[%s1763_s11 + $0x38] sm:$0xff]  ;;  %v233_v57 = vld [vmem:[%s1763_s11 + $0x30] sm:$0xff]  ;;  %s211_s23 = scalar_lea.vmem [#allocation2], %s1398_s14  ;;  %s2273_s5 = scalar_lea.hbm %s2320_s4, %s1439_s20 }
  0x24   : > { %270 = vperm.xlu1 %1486, %v240_v18   ;;  %265 = vperm.xlu0 %1485, %v239_v20   ;;  %s1323_s28 = sshll.u32 %s211_s23, 4  ;;  %s1310_s6 = scalar_lea.sflag [#allocation3], %s209_s13  ;;  %s2275_s28 = int_to_ptr.vmem [resolvable:$true] %s1323_s28 }
  0x25   : > { %459 = vmatpush1.bf16.msra.mxu0 %v1509_v21  ;;  %532 = vmatpush1.bf16.msra.mxu1 %v1510_v22  ;;  %v1829_v21 = vadd.s32 24, %v1787_v62  ;;  %s1523_s7 = scalar_lea.vmem %s2275_s28, 64  ;;  %s1589_s19 = smov [#allocation2]  }
  0x26   : > { %460 = vmatprep.subr.bf16.mxu0 %v1511_v23  ;;  %533 = vmatprep.subr.bf16.mxu1 %v1513_v24  ;;  %v1839_v23 = vadd.s32 4294967295, %v2324_v5  ;;  %p1524_p11 = scmp.ne.s32.totalorder %s2275_s28, %s1523_s7  ;;  %s1527_s8 = sshll.u32 %s1589_s19, 4  ;;  %s1528_s8 = int_to_ptr.vmem [resolvable:$false] %s1527_s8 }
  0x27   : > { %s1529_s9 = scalar_lea.vmem %s1528_s8, 128  ;;  %p1530_p0 = scmp.lt.s32.totalorder %s2275_s28, %s1528_s8 }
  0x28   : > { %280 = vperm.xlu1 %1486, %v242_v25   ;;  %275 = vperm.xlu0 %1485, %v241_v26   ;;  %v2323_v25 = vand.u32 15, %v1812_v9  ;;  %vm731_vm3 = vcmp.ge.s32.totalorder %v1839_v23, 0  ;;  %p1525_p12 = pnand %p1524_p11, %p1653_p5  ;;  %p1531_p1 = scmp.lt.s32.totalorder %s1529_s9, %s1523_s7 }
  0x29   : > { %461 = vmatpush1.bf16.msra.mxu0 %v1515_v27  ;;  %534 = vmatpush1.bf16.msra.mxu1 %v1516_v28  ;;  %v1856_v27 = vadd.s32 1, %v2322_v8 }
  0x2a   : > { %462 = vmatprep.subr.bf16.mxu0 %v1517_v29  ;;  %535 = vmatprep.subr.bf16.mxu1 %v1519_v30  ;;  %p1526_p13 = pneg %p1525_p12  ;;  %p1532_p2 = por %p1531_p1, %p1530_p0 }
  0x2b   : > { %vm843_vm4 = vcmp.lt.s32.totalorder %v1856_v27, 16 }
  0x2c   : > { %p1533_p3 = pnand %p1532_p2, %p1526_p13 }
  0x2d   : > { %463 = vmatpush1.bf16.msra.mxu0 %v1521_v31  ;;  %536 = vmatpush1.bf16.msra.mxu1 %v1522_v32 }
  0x9b   : > { %v246_v33 = vpop.permute.xlu0 %245  ;;  %v256_v36 = vpop.permute.xlu1 %255 }
  0x9c   : > { %v283_v38 = vmul.f32 %v246_v33, %v227_v34  ;;  %v285_v44 = vmul.f32 %v256_v36, %v229_v41  ;;  %v2321_v34 = vand.u32 15, %v1829_v21 }
  0x9f   : > { %v251_v37 = vpop.permute.xlu0 %250  ;;  %v261_v43 = vpop.permute.xlu1 %260 }
  0xa0   : > { %v284_v39 = vmul.f32 %v251_v37, %v228_v35  ;;  %v286_v45 = vmul.f32 %v261_v43, %v230_v42 }
  0xa2   : > { %v291_v40 = vpack.c.bf16 %v284_v39, %v283_v38  ;;  %v292_v46 = vpack.c.bf16 %v286_v45, %v285_v44  ;;  %v1870_v39 = vadd.s32 4294967295, %v2323_v25 }
  0xa3   : > { %v271_v47 = vpop.permute.xlu1 %270  ;;  %v266_v49 = vpop.permute.xlu0 %265 }
  0xa4   : > { %1429 = vmatmul.mubr.msk.bf16.vlgmr.msra.gmra.mrb[0].mxu0 %vm439_vm0, %v291_v40  ;;  %1433 = vmatmul.mubr.msk.bf16.vlgmr.msra.gmra.mrb[0].mxu1 %vm439_vm0, %v291_v40  ;;  %v288_v51 = vmul.f32 %v271_v47, %v232_v48  ;;  %v287_v52 = vmul.f32 %v266_v49, %v231_v50  ;;  %v1889_v49 = vadd.s32 48, %v1787_v62  ;;  %vm733_vm5 = vcmp.ge.s32.totalorder %v1870_v39, 0 }
  0xa5   : > { %494 = vmatprep.mubr.bf16.mxu0 %v1587_v1  ;;  %567 = vmatprep.mubr.bf16.mxu1 %v1587_v1 }
  0xa6   : > { %v293_v53 = vpack.c.bf16 %v288_v51, %v287_v52 }
  0xa7   : > { %v281_v54 = vpop.permute.xlu1 %280  ;;  %v276_v56 = vpop.permute.xlu0 %275 }
  0xa8   : > { %v290_v58 = vmul.f32 %v281_v54, %v234_v55  ;;  %v289_v59 = vmul.f32 %v276_v56, %v233_v57  ;;  %v1911_v55 = vadd.s32 40, %v1787_v62 }
  0xaa   : > { %v294_v60 = vpack.c.bf16 %v290_v58, %v289_v59 }
  0xac   : > { %1430 = vmatmul.mubr.msk.bf16.gmra.mrb[4].mxu0 %vm439_vm0, %v292_v46  ;;  %1434 = vmatmul.mubr.msk.bf16.gmra.mrb[4].mxu1 %vm439_vm0, %v292_v46 }
  0xad   : > { %504 = vmatprep.mubr.bf16.mxu0 %v1587_v1  ;;  %577 = vmatprep.mubr.bf16.mxu1 %v1587_v1 }
  0xb4   : > { %1431 = vmatmul.mubr.msk.bf16.gmra.mrb[8].mxu0 %vm439_vm0, %v293_v53  ;;  %1435 = vmatmul.mubr.msk.bf16.gmra.mrb[8].mxu1 %vm439_vm0, %v293_v53  ;;  %v1904_v53 = vadd.s32 1, %v2321_v34 }
  0xb5   : > { %514 = vmatprep.mubr.bf16.mxu0 %v1587_v1  ;;  %587 = vmatprep.mubr.bf16.mxu1 %v1587_v1 }
  0xb6   : > { %vm845_vm6 = vcmp.lt.s32.totalorder %v1904_v53, 16 }
  0xbc   : > { %1432 = vmatmul.mubr.msk.bf16.gmra.mrb[12].mxu0 %vm439_vm0, %v294_v60  ;;  %1436 = vmatmul.mubr.msk.bf16.gmra.mrb[12].mxu1 %vm439_vm0, %v294_v60 }
 0x177   : > { %v1795_v2 = vpop.f32.mrb[0].mxu0  ;;  %v1797_v3 = vpop.f32.mrb[0].mxu1 }
 0x178   : > { %1070 = vrot.lane.b32.xlu0 %v1797_v3, %s1588_s27  ;;  %v1801_v1 = vpop.f32.mrb[1].mxu0  ;;  %v1803_v4 = vpop.f32.mrb[1].mxu1  ;;  %v2329_v10 = vrot.slane %v1795_v2, 7  ;;  %v2326_v11 = vrot.slane %v1797_v3, 7 }
 0x179   : > { %v1806_v6 = vpop.f32.mrb[2].mxu0  ;;  %v563_v7 = vpop.f32.mrb[2].mxu1  ;;  %v2325_v16 = vrot.slane %v1801_v1, 1  ;;  %v2328_v17 = vrot.slane %v1803_v4, 1 }
 0x17a   : > { %v705_v12 = vrot.slane %v1806_v6, 7  ;;  %v1031_v13 = vrot.slane %v563_v7, 7  ;;  %1072 = vrot.lane.b32.xlu1 %v563_v7, %s1588_s27  ;;  %v492_v14 = vpop.f32.mrb[3].mxu0  ;;  %v565_v15 = vpop.f32.mrb[3].mxu1 }
 0x17b   : > { %v810_v18 = vrot.slane %v492_v14, 1  ;;  %v1103_v19 = vrot.slane %v565_v15, 1 }
 0x17c   : > { %v1824_v20 = vsel %vm712_vm1, %v2326_v11, %v1031_v13  ;;  %941 = vrot.lane.b32.xlu0 %v1801_v1, %s1588_s27  ;;  %v1835_v22 = vsel %vm712_vm1, %v2329_v10, %v705_v12 }
 0x17d   : > { %2333 = vst [vmem:[#allocation5_spill] sm:$0xff] %v1835_v22  ;;  %v1845_v24 = vsel %vm817_vm2, %v2328_v17, %v1103_v19  ;;  %v1852_v26 = vsel %vm817_vm2, %v2325_v16, %v810_v18 }
 0x17e   : > { %2334 = vst [vmem:[#allocation6_spill] sm:$0xff] %v1852_v26  ;;  %943 = vrot.lane.b32.xlu1 %v492_v14, %s1588_s27  ;;  %v2346_v26 = vrot.slane %v1803_v4, 1 }
 0x17f   : > { %v1859_v28 = vpop.f32.mrb[4].mxu0  ;;  %v569_v29 = vpop.f32.mrb[4].mxu1 }
 0x180   : > { %v706_v30 = vrot.slane %v1859_v28, 7  ;;  %v1032_v31 = vrot.slane %v569_v29, 7  ;;  %v571_v32 = vpop.f32.mrb[5].mxu1  ;;  %1142 = vrot.lane.b32.xlu0 %v1803_v4, %s1588_s27  ;;  %v498_v33 = vpop.f32.mrb[5].mxu0 }
 0x181   : > { %v1104_v35 = vrot.slane %v571_v32, 1  ;;  %v811_v36 = vrot.slane %v498_v33, 1  ;;  %v1866_v37 = vpop.f32.mrb[6].mxu0  ;;  %v573_v38 = vpop.f32.mrb[6].mxu1 }
 0x182   : > { %v707_v40 = vrot.slane %v1866_v37, 7  ;;  %v1033_v41 = vrot.slane %v573_v38, 7  ;;  %v1874_v42 = vpop.f32.mrb[7].mxu1  ;;  %1146 = vrot.lane.b32.xlu1 %v571_v32, %s1588_s27  ;;  %v502_v43 = vpop.f32.mrb[7].mxu0  ;;  %v718_v44 = vsel %vm712_vm1, %v705_v12, %v706_v30  ;;  %v1881_v45 = vsel %vm712_vm1, %v1031_v13, %v1032_v31 }
 0x183   : > { %v1885_v46 = vsel %vm817_vm2, %v1103_v19, %v1104_v35  ;;  %v1105_v47 = vrot.slane %v1874_v42, 1  ;;  %v812_v48 = vrot.slane %v502_v43, 1  ;;  %v823_v51 = vsel %vm817_vm2, %v810_v18, %v811_v36 }
 0x184   : > { %v1893_v50 = vsel %vm712_vm1, %v1032_v31, %v1033_v41  ;;  %1144 = vrot.lane.b32.xlu0 %v565_v15, %s1588_s27  ;;  %v1900_v52 = vsel %vm731_vm3, %v718_v44, 0.0  ;;  %v1915_v56 = vsel %vm843_vm4, %v823_v51, 0.0  ;;  %v1924_v58 = vsel %vm712_vm1, %v706_v30, %v707_v40 }
 0x185   : > { %2335 = vst [vmem:[#allocation7_spill] sm:$0xff] %v1900_v52  ;;  %v1908_v54 = vsel %vm817_vm2, %v1104_v35, %v1105_v47  ;;  %2336 = vst [vmem:[#allocation8_spill] sm:$0xff] %v1915_v56  ;;  %v1919_v57 = vsel %vm817_vm2, %v811_v36, %v812_v48  ;;  %v2327_v18 = vand.u32 15, %v1787_v62  ;;  %v2330_v35 = vand.u32 15, %v1911_v55 }
 0x186   : > { %2337 = vst [vmem:[#allocation9_spill] sm:$0xff] %v1919_v57  ;;  %1076 = vrot.lane.b32.xlu1 %v573_v38, %s1588_s27  ;;  %2338 = vst [vmem:[#allocation10_spill] sm:$0xff] %v1924_v58 }
 0x187   : > { %v1926_v59 = vpop.f32.mrb[8].mxu0  ;;  %v1928_v60 = vpop.f32.mrb[8].mxu1 }
 0x188   : > { %v708_v7 = vrot.slane %v1926_v59, 7  ;;  %v1034_v12 = vrot.slane %v1928_v60, 7  ;;  %v581_v13 = vpop.f32.mrb[9].mxu1  ;;  %1074 = vrot.lane.b32.xlu0 %v569_v29, %s1588_s27  ;;  %v508_v14 = vpop.f32.mrb[9].mxu0 }
 0x189   : > { %v1106_v19 = vrot.slane %v581_v13, 1  ;;  %v813_v30 = vrot.slane %v508_v14, 1  ;;  %v1939_v31 = vpop.f32.mrb[10].mxu0  ;;  %v583_v32 = vpop.f32.mrb[10].mxu1 }
 0x18a   : > { %v709_v36 = vrot.slane %v1939_v31, 7  ;;  %v1035_v38 = vrot.slane %v583_v32, 7  ;;  %v585_v44 = vpop.f32.mrb[11].mxu1  ;;  %949 = vrot.lane.b32.xlu1 %v508_v14, %s1588_s27  ;;  %v512_v29 = vpop.f32.mrb[11].mxu0  ;;  %v1947_v51 = vsel %vm712_vm1, %v1033_v41, %v1034_v12  ;;  %v716_v34 = vsel %vm712_vm1, %v707_v40, %v708_v7 }
 0x18b   : > { %v1953_v8 = vsel %vm817_vm2, %v1105_v47, %v1106_v19  ;;  %v1107_v25 = vrot.slane %v585_v44, 1  ;;  %v814_v5 = vrot.slane %v512_v29, 1  ;;  %v1963_v41 = vadd.s32 4294967295, %v2327_v18 }
 0x18c   : > { %v1958_v11 = vsel %vm712_vm1, %v1034_v12, %v1035_v38  ;;  %945 = vrot.lane.b32.xlu0 %v498_v33, %s1588_s27  ;;  %v821_v40 = vsel %vm817_vm2, %v812_v48, %v813_v30  ;;  %v1969_v47 = vsel %vm733_vm5, %v716_v34, 0.0  ;;  %v1985_v18 = vsel %vm712_vm1, %v708_v7, %v709_v36 }
 0x18d   : > { %2339 = vst [vmem:[#allocation11_spill] sm:$0xff] %v1969_v47  ;;  %v1973_v14 = vsel %vm817_vm2, %v1106_v19, %v1107_v25  ;;  %v1977_v12 = vsel %vm845_vm6, %v821_v40, 0.0  ;;  %v1981_v33 = vsel %vm817_vm2, %v813_v30, %v814_v5  ;;  %2342 = vst [vmem:[#allocation14_spill] sm:$0xff] %v1985_v18  ;;  %v1991_v40 = vadd.s32 1, %v2330_v35 }
 0x18e   : > { %2340 = vst [vmem:[#allocation12_spill] sm:$0xff] %v1977_v12  ;;  %2341 = vst [vmem:[#allocation13_spill] sm:$0xff] %v1981_v33  ;;  %1150 = vrot.lane.b32.xlu1 %v581_v13, %s1588_s27  ;;  %v2343_v33 = vand.u32 15, %v1889_v49  ;;  %v2344_v13 = vand.u32 15, %v1932_v61  ;;  %vm729_vm7 = vcmp.ge.s32.totalorder %v1963_v41, 0 }
 0x18f   : > { %v516_v34 = vpop.f32.mrb[12].mxu0  ;;  %v589_v48 = vpop.f32.mrb[12].mxu1  ;;  %vm847_vm8 = vcmp.lt.s32.totalorder %v1991_v40, 16 }
 0x190   : > { %v1036_v17 = vrot.slane %v589_v48, 7  ;;  %v591_v10 = vpop.f32.mrb[13].mxu1  ;;  %947 = vrot.lane.b32.xlu0 %v502_v43, %s1588_s27  ;;  %v518_v19 = vpop.f32.mrb[13].mxu0  ;;  %v1995_v7 = vadd.s32 4294967295, %v2343_v33  ;;  %v1999_v18 = vadd.s32 1, %v2344_v13  ;;  %v710_v52 = vrot.slane %v516_v34, 7 }
 0x191   : > { %v1108_v16 = vrot.slane %v591_v10, 1  ;;  %v520_v30 = vpop.f32.mrb[14].mxu0  ;;  %v593_v15 = vpop.f32.mrb[14].mxu1  ;;  %v815_v47 = vrot.slane %v518_v19, 1 }
 0x192   : > { %v711_v43 = vrot.slane %v520_v30, 7  ;;  %v1037_v12 = vrot.slane %v593_v15, 7  ;;  %v595_v58 = vpop.f32.mrb[15].mxu1  ;;  %1080 = vrot.lane.b32.xlu1 %v583_v32, %s1588_s27  ;;  %v522_v35 = vpop.f32.mrb[15].mxu0  ;;  %v2005_v57 = vsel %vm712_vm1, %v1035_v38, %v1036_v17  ;;  %v2345_v32 = vrot.slane %v1795_v2, 7 }
 0x193   : > { %v2009_v33 = vsel %vm817_vm2, %v1107_v25, %v1108_v16  ;;  %v1109_v13 = vrot.slane %v595_v58, 1  ;;  %v816_v56 = vrot.slane %v522_v35, 1  ;;  %vm735_vm9 = vcmp.ge.s32.totalorder %v1995_v7, 0 }
 0x194   : > { %1148 = vrot.lane.b32.xlu0 %v1874_v42, %s1588_s27  ;;  %v2015_v22 = vsel %vm712_vm1, %v1036_v17, %v1037_v12  ;;  %v720_v38 = vsel %vm712_vm1, %v711_v43, %v2345_v32  ;;  %vm849_vm10 = vcmp.lt.s32.totalorder %v1999_v18, 16  ;;  %v2347_v32 = vrot.slane %v1797_v3, 7 }
 0x195   : > { %v2025_v25 = vsel %vm817_vm2, %v1108_v16, %v1109_v13  ;;  %v2031_v42 = vsel %vm817_vm2, %v1109_v13, %v2346_v26  ;;  %v2035_v17 = vsel %vm729_vm7, %v720_v38, 0.0  ;;  %v819_v4 = vsel %vm817_vm2, %v814_v5, %v815_v47 }
 0x196   : > { %1152 = vrot.lane.b32.xlu1 %v585_v44, %s1588_s27  ;;  %v2043_v16 = vsel %vm712_vm1, %v1037_v12, %v2347_v32  ;;  %v2049_v26 = vsel %vm847_vm8, %v819_v4, 0.0  ;;  %v714_v13 = vsel %vm712_vm1, %v709_v36, %v710_v52  ;;  %v2055_v44 = vsel %vm817_vm2, %v815_v47, %v816_v56 }
 0x197   : > { %v2061_v3 = vsel %vm735_vm9, %v714_v13, 0.0  ;;  %v2065_v5 = vsel %vm712_vm1, %v710_v52, %v711_v43  ;;  %v2348_v12 = vrot.slane %v1801_v1, 1  ;;  %v2084_v1 = vld [vmem:[%s2319_s3] ss:$0 sm:$0xff] }
 0x198   : > { %1078 = vrot.lane.b32.xlu0 %v1928_v60, %s1588_s27 }
 0x199   : > { %v825_v36 = vsel %vm817_vm2, %v816_v56, %v2348_v12 }
 0x19a   : > { %v2073_v47 = vsel %vm849_vm10, %v825_v36, 0.0  ;;  %953 = vrot.lane.b32.xlu1 %v518_v19, %s1588_s27  ;;  %v2349_v19 = vand.u32 15, %v1790_v63  ;;  %v1048_v36 = vsel %vm731_vm3, %v1881_v45, 0.0 }
 0x19c   : > { %951 = vrot.lane.b32.xlu0 %v512_v29, %s1588_s27 }
 0x19e   : > { %955 = vrot.lane.b32.xlu1 %v522_v35, %s1588_s27  ;;  %v1119_v35 = vsel %vm843_vm4, %v1885_v46, 0.0 }
 0x1a0   : > { %1154 = vrot.lane.b32.xlu0 %v591_v10, %s1588_s27 }
 0x1a2   : > { %1082 = vrot.lane.b32.xlu1 %v589_v48, %s1588_s27 }
 0x1a4   : > { %1084 = vrot.lane.b32.xlu0 %v593_v15, %s1588_s27 }
 0x1a6   : > { %1156 = vrot.lane.b32.xlu1 %v595_v58, %s1588_s27 }
 0x1a8   : > { %1231 = vrot.lane.b32.xlu0 %v2084_v1, %s1588_s27 }
 0x1aa   : > { %777 = vrot.lane.b32.xlu1 %v1795_v2, %s1588_s27 }
 0x1ac   : > { %779 = vrot.lane.b32.xlu0 %v1806_v6, %s1588_s27 }
 0x1ae   : > { %781 = vrot.lane.b32.xlu1 %v1859_v28, %s1588_s27 }
 0x1b0   : > { %783 = vrot.lane.b32.xlu0 %v1866_v37, %s1588_s27 }
 0x1b2   : > { %785 = vrot.lane.b32.xlu1 %v1926_v59, %s1588_s27 }
 0x1b4   : > { %787 = vrot.lane.b32.xlu0 %v1939_v31, %s1588_s27 }
 0x1b6   : > { %789 = vrot.lane.b32.xlu1 %v516_v34, %s1588_s27 }
 0x1b8   : > { %791 = vrot.lane.b32.xlu0 %v520_v30, %s1588_s27  ;;  %v984_v30 = vadd.s32 4294967294, %v2349_v19 }
 0x1ba   : > { %vm992_vm12 = vcmp.ge.s32.totalorder %v984_v30, 0 }
 0x1ea   : > { %v2103_v2 = vpop.permute.xlu0 %1070 }
 0x1ec   : > { %v1073_v10 = vpop.permute.xlu1 %1072 }
 0x1ee   : > { %v2105_v6 = vpop.permute.xlu0 %941 }
 0x1ef   : > { %v965_v37 = vrot.slane %v2105_v6, 6 }
 0x1f0   : > { %v944_v28 = vpop.permute.xlu1 %943 }
 0x1f1   : > { %v966_v52 = vrot.slane %v944_v28, 6 }
 0x1f2   : > { %v2109_v56 = vpop.permute.xlu0 %1142 }
 0x1f3   : > { %v980_v58 = vsel %vm973_vm11, %v965_v37, %v966_v52 }
 0x1f4   : > { %v1055_v59 = vadd.f32 %v1824_v20, %v980_v58  ;;  %v2116_v60 = vpop.permute.xlu1 %1146  ;;  %v2350_v20 = vand.u32 15, %v1812_v9 }
 0x1f6   : > { %v1095_v15 = vadd.f32 %v1073_v10, %v1055_v59  ;;  %v2118_v31 = vpop.permute.xlu0 %1144  ;;  %v986_v4 = vadd.s32 4294967294, %v2350_v20  ;;  %v2352_v20 = vand.u32 15, %v1829_v21 }
 0x1f7   : > { %v1167_v53 = vrot.slane %v2118_v31, 2  ;;  %v1046_v31 = vsel %vm729_vm7, %v2043_v16, 0.0  ;;  %vm1292_vm7 = vcmask 1042434  }
 0x1f8   : > { %v1077_v29 = vpop.permute.xlu1 %1076  ;;  %v2123_v34 = vadd.f32 %v1119_v35, %v1095_v15  ;;  %vm994_vm13 = vcmp.ge.s32.totalorder %v986_v4, 0 }
 0x1fa   : > { %v1075_v48 = vpop.permute.xlu0 %1074 }
 0x1fc   : > { %v950_v43 = vpop.permute.xlu1 %949 }
 0x1fd   : > { %v969_v63 = vrot.slane %v950_v43, 6  ;;  %v1050_v43 = vsel %vm733_vm5, %v1947_v51, 0.0  ;;  %vm896_vm5 = vcmask 523264  }
 0x1fe   : > { %v946_v38 = vpop.permute.xlu0 %945 }
 0x1ff   : > { %v967_v32 = vrot.slane %v946_v38, 6  ;;  %v2351_v38 = vand.u32 15, %v1793_v0  ;;  %v2355_v0 = vand.u32 15, %v1911_v55  ;;  %v1168_v55 = vrot.slane %v2116_v60, 2 }
 0x200   : > { %v2129_v13 = vpop.permute.xlu1 %1150 }
 0x201   : > { %v979_v27 = vsel %vm973_vm11, %v966_v52, %v967_v32  ;;  %v1180_v7 = vsel %vm1174_vm14, %v1167_v53, %v1168_v55 }
 0x202   : > { %v948_v46 = vpop.permute.xlu0 %947  ;;  %v1016_v12 = vsel %vm992_vm12, %v979_v27, 0.0 }
 0x203   : > { %v968_v10 = vrot.slane %v948_v46, 6  ;;  %v1056_v28 = vadd.f32 %v1048_v36, %v1016_v12  ;;  %v2354_v46 = vand.u32 15, %v1787_v62  ;;  %v1188_v36 = vadd.s32 2, %v2355_v0 }
 0x204   : > { %v1081_v58 = vpop.permute.xlu1 %1080 }
 0x205   : > { %v978_v9 = vsel %vm973_vm11, %v967_v32, %v968_v10  ;;  %v977_v59 = vsel %vm973_vm11, %v968_v10, %v969_v63  ;;  %v1096_v15 = vadd.f32 %v1075_v48, %v1056_v28  ;;  %v1184_v32 = vadd.s32 2, %v2351_v38 }
 0x206   : > { %v1057_v52 = vadd.f32 %v1893_v50, %v978_v9  ;;  %v1149_v35 = vpop.permute.xlu0 %1148  ;;  %v1018_v19 = vsel %vm994_vm13, %v977_v59, 0.0  ;;  %v1186_v48 = vadd.s32 2, %v2352_v20  ;;  %v1121_v50 = vsel %vm845_vm6, %v1953_v8, 0.0 }
 0x207   : > { %v2142_v30 = vadd.f32 %v1908_v54, %v1096_v15  ;;  %v1058_v4 = vadd.f32 %v1050_v43, %v1018_v19  ;;  %v982_v12 = vadd.s32 4294967294, %v2354_v46  ;;  %vm1200_vm15 = vcmp.lt.s32.totalorder %v1184_v32, 16 }
 0x208   : > { %v1097_v23 = vadd.f32 %v1077_v29, %v1057_v52  ;;  %v2144_v45 = vpop.permute.xlu1 %1152  ;;  %v2353_v29 = vand.u32 15, %v1889_v49  ;;  %vm1202_vm0 = vcmp.lt.s32.totalorder %v1186_v48, 16  ;;  %v1169_v49 = vrot.slane %v1149_v35, 2 }
 0x209   : > { %v1052_v28 = vsel %vm735_vm9, %v2005_v57, 0.0  ;;  %vm990_vm2 = vcmp.ge.s32.totalorder %v982_v12, 0  ;;  %vm1204_vm3 = vcmp.lt.s32.totalorder %v1188_v36, 16  ;;  %v1170_v15 = vrot.slane %v2129_v13, 2 }
 0x20a   : > { %v1079_v54 = vpop.permute.xlu0 %1078  ;;  %v988_v27 = vadd.s32 4294967294, %v2353_v29  ;;  %v2160_v39 = vadd.f32 %v1121_v50, %v1097_v23  ;;  %v1123_v57 = vsel %vm847_vm8, %v2009_v33, 0.0  ;;  %v1171_v41 = vrot.slane %v2144_v45, 2 }
 0x20b   : > { %v1098_v51 = vadd.f32 %v1079_v54, %v1058_v4  ;;  %v1178_v18 = vsel %vm1174_vm14, %v1169_v49, %v1170_v15  ;;  %v2356_v45 = vand.u32 15, %v1932_v61  ;;  %v1216_v50 = vsel %vm1200_vm15, %v1180_v7, 0.0 }
 0x20c   : > { %v954_v21 = vpop.permute.xlu1 %953  ;;  %vm996_vm1 = vcmp.ge.s32.totalorder %v988_v27, 0  ;;  %v1166_v29 = vrot.slane %v2109_v56, 2  ;;  %v1218_v27 = vsel %vm1202_vm0, %v1178_v18, 0.0  ;;  %v1224_v56 = vadd.f32 %v1216_v50, %v2123_v34  ;;  %v2360_v50 = vld [vmem:[#allocation7_spill] sm:$0xff] }
 0x20d   : > { %v1130_v8 = vadd.f32 %v1973_v14, %v1098_v51  ;;  %v971_v9 = vrot.slane %v954_v21, 6  ;;  %v1125_v14 = vsel %vm849_vm10, %v2031_v42, 0.0  ;;  %v1177_v48 = vsel %vm1174_vm14, %v1170_v15, %v1171_v41 }
 0x20e   : > { %v952_v10 = vpop.permute.xlu0 %951  ;;  %v1181_v0 = vsel %vm1174_vm14, %v1166_v29, %v1167_v53  ;;  %vm1290_vm6 = vcmask 1041409   ;;  %vm1294_vm8 = vcmask 1043459  }
 0x20f   : > { %v970_v59 = vrot.slane %v952_v10, 6 }
 0x210   : > { %v956_v52 = vpop.permute.xlu1 %955 }
 0x211   : > { %v976_v60 = vsel %vm973_vm11, %v969_v63, %v970_v59  ;;  %v972_v13 = vrot.slane %v956_v52, 6  ;;  %v975_v35 = vsel %vm973_vm11, %v970_v59, %v971_v9 }
 0x212   : > { %v1059_v42 = vadd.f32 %v1958_v11, %v976_v60  ;;  %v1155_v16 = vpop.permute.xlu0 %1154  ;;  %v1020_v40 = vsel %vm996_vm1, %v975_v35, 0.0  ;;  %v1190_v11 = vadd.s32 2, %v2356_v45  ;;  %v2359_v45 = vld [vmem:[#allocation8_spill] sm:$0xff] }
 0x213   : > { %v981_v33 = vsel %vm973_vm11, %v972_v13, %v965_v37  ;;  %v1172_v63 = vrot.slane %v1155_v16, 2  ;;  %v1060_v19 = vadd.f32 %v1052_v28, %v1020_v40  ;;  %v974_v23 = vsel %vm973_vm11, %v971_v9, %v972_v13 }
 0x214   : > { %v1099_v43 = vadd.f32 %v1081_v58, %v1059_v42  ;;  %v1083_v38 = vpop.permute.xlu1 %1082  ;;  %v1061_v20 = vadd.f32 %v2015_v22, %v974_v23  ;;  %v1014_v4 = vsel %vm990_vm2, %v981_v33, 0.0  ;;  %v1179_v58 = vsel %vm1174_vm14, %v1168_v55, %v1169_v49  ;;  %v2357_v42 = vld [vmem:[#allocation6_spill] sm:$0xff]  ;;  %v2358_v33 = vld [vmem:[#allocation5_spill] sm:$0xff] }
 0x215   : > { %v1176_v6 = vsel %vm1174_vm14, %v1171_v41, %v1172_v63  ;;  %v1100_v37 = vadd.f32 %v1083_v38, %v1060_v19  ;;  %v1054_v54 = vadd.f32 %v1046_v31, %v1014_v4  ;;  %vm1206_vm4 = vcmp.lt.s32.totalorder %v1190_v11, 16 }
 0x216   : > { %v1085_v22 = vpop.permute.xlu0 %1084  ;;  %v1131_v46 = vadd.f32 %v1123_v57, %v1099_v43  ;;  %v1220_v61 = vsel %vm1204_vm3, %v1176_v6, 0.0  ;;  %v1227_v28 = vadd.f32 %v1177_v48, %v1130_v8  ;;  %v1225_v55 = vadd.f32 %v1179_v58, %v2142_v30 }
 0x217   : > { %v1132_v12 = vadd.f32 %v2025_v25, %v1100_v37  ;;  %v1101_v32 = vadd.f32 %v1085_v22, %v1061_v20  ;;  %v1094_v51 = vadd.f32 %v2103_v2, %v1054_v54  ;;  %v1226_v2 = vadd.f32 %v1218_v27, %v2160_v39 }
 0x218   : > { %v1157_v21 = vpop.permute.xlu1 %1156  ;;  %v1228_v9 = vadd.f32 %v1220_v61, %v1131_v46  ;;  %v2361_v61 = vld [vmem:[#allocation9_spill] sm:$0xff] }
 0x219   : > { %v1133_v49 = vadd.f32 %v1125_v14, %v1101_v32  ;;  %v1173_v10 = vrot.slane %v1157_v21, 2  ;;  %v1126_v36 = vadd.f32 %v1845_v24, %v1094_v51  ;;  %v2362_v32 = vld [vmem:[#allocation10_spill] sm:$0xff] }
 0x21a   : > { %v1232_v25 = vpop.permute.xlu0 %1231 }
 0x21b   : > { %v1175_v53 = vsel %vm1174_vm14, %v1172_v63, %v1173_v10  ;;  %v1182_v34 = vsel %vm1174_vm14, %v1173_v10, %v1166_v29  ;;  %v1223_v59 = vadd.f32 %v1181_v0, %v1126_v36  ;;  %v1235_v52 = vadd.f32 %v1232_v25, %v1224_v56 }
 0x21c   : > { %v1222_v15 = vsel %vm1206_vm4, %v1182_v34, 0.0  ;;  %v1229_v14 = vadd.f32 %v1175_v53, %v1132_v12  ;;  %v778_v31 = vpop.permute.xlu1 %777  ;;  %v1236_v24 = vadd.f32 %v1232_v25, %v1225_v55  ;;  %v1237_v8 = vadd.f32 %v1232_v25, %v1226_v2 }
 0x21d   : > { %v1230_v57 = vadd.f32 %v1222_v15, %v1133_v49  ;;  %v1234_v7 = vadd.f32 %v1232_v25, %v1223_v59  ;;  %v801_v30 = vadd.f32 %v778_v31, %v2035_v17  ;;  %v1243_v39 = vmax.f32 %v1235_v52, 0.0 }
 0x21e   : > { %v780_v60 = vpop.permute.xlu0 %779  ;;  %v1244_v13 = vmax.f32 %v1236_v24, 0.0  ;;  %v1245_v35 = vmax.f32 %v1237_v8, 0.0  ;;  %v1238_v18 = vadd.f32 %v1232_v25, %v1227_v28  ;;  %v1239_v41 = vadd.f32 %v1232_v25, %v1228_v9  ;;  %v2363_v28 = vld [vmem:[#allocation12_spill] sm:$0xff]  ;;  %v2364_v9 = vld [vmem:[#allocation11_spill] sm:$0xff]  ;;  %v2365_v8 = vld [vmem:[#allocation14_spill] sm:$0xff] }
 0x21f   : > { %v1242_v62 = vmax.f32 %v1234_v7, 0.0  ;;  %v866_v16 = vadd.f32 %v2357_v42, %v801_v30  ;;  %v1251_v40 = vsel %vm896_vm5, %v1243_v39, -inf  ;;  %v802_v63 = vadd.f32 %v780_v60, %v2358_v33  ;;  %v2366_v30 = vld [vmem:[#allocation13_spill] sm:$0xff] }
 0x220   : > { %v782_v19 = vpop.permute.xlu1 %781  ;;  %v1259_v23 = vsel %vm896_vm5, %v1244_v13, -inf  ;;  %v1260_v43 = vsel %vm896_vm5, %v1245_v35, -inf  ;;  %v1246_v38 = vmax.f32 %v1238_v18, 0.0  ;;  %v1247_v17 = vmax.f32 %v1239_v41, 0.0 }
 0x221   : > { %v880_v20 = vadd.f32 %v2084_v1, %v866_v16  ;;  %v867_v11 = vadd.f32 %v2359_v45, %v802_v63  ;;  %v1250_v4 = vsel %vm896_vm5, %v1242_v62, -inf  ;;  %v803_v6 = vadd.f32 %v782_v19, %v2360_v50 }
 0x222   : > { %v1252_v37 = vmax.f32 %v1250_v4, %v1251_v40  ;;  %v1261_v54 = vmax.f32 %v1259_v23, %v1260_v43  ;;  %v784_v29 = vpop.permute.xlu0 %783  ;;  %v1268_v58 = vsel %vm896_vm5, %v1246_v38, -inf  ;;  %v1269_v27 = vsel %vm896_vm5, %v1247_v17, -inf }
 0x223   : > { %v888_v22 = vmax.f32 %v880_v20, 0.0  ;;  %v881_v46 = vadd.f32 %v2084_v1, %v867_v11  ;;  %v868_v12 = vadd.f32 %v2361_v61, %v803_v6  ;;  %v804_v51 = vadd.f32 %v784_v29, %v2362_v32 }
 0x224   : > { %v1253_v0 = vrot.slane %v1252_v37, 4  ;;  %v786_v21 = vpop.permute.xlu1 %785  ;;  %v1270_v56 = vmax.f32 %v1268_v58, %v1269_v27  ;;  %v1240_v48 = vadd.f32 %v1232_v25, %v1229_v14  ;;  %v1262_v36 = vrot.slane %v1261_v54, 4 }
 0x225   : > { %v889_v49 = vmax.f32 %v881_v46, 0.0  ;;  %v882_v10 = vadd.f32 %v2084_v1, %v868_v12  ;;  %v869_v55 = vadd.f32 %v2363_v28, %v804_v51  ;;  %v897_v2 = vsel %vm896_vm5, %v888_v22, -inf }
 0x226   : > { %v805_v53 = vadd.f32 %v786_v21, %v2364_v9  ;;  %v788_v34 = vpop.permute.xlu0 %787  ;;  %v1241_v59 = vadd.f32 %v1232_v25, %v1230_v57  ;;  %v1254_v52 = vmax.f32 %v1252_v37, %v1253_v0  ;;  %v1248_v13 = vmax.f32 %v1240_v48, 0.0 }
 0x227   : > { %v898_v15 = vsel %vm896_vm5, %v889_v49, -inf  ;;  %v890_v31 = vmax.f32 %v882_v10, 0.0  ;;  %v883_v24 = vadd.f32 %v2084_v1, %v869_v55  ;;  %v806_v14 = vadd.f32 %v788_v34, %v2365_v8 }
 0x228   : > { %v899_v7 = vmax.f32 %v897_v2, %v898_v15  ;;  %v870_v39 = vadd.f32 %v2366_v30, %v805_v53  ;;  %v790_v60 = vpop.permute.xlu1 %789  ;;  %v1255_v35 = vrot.slane %v1254_v52, 2  ;;  %v1263_v33 = vmax.f32 %v1261_v54, %v1262_v36 }
 0x229   : > { %v906_v18 = vsel %vm896_vm5, %v890_v31, -inf  ;;  %v891_v41 = vmax.f32 %v883_v24, 0.0  ;;  %v871_v62 = vadd.f32 %v2049_v26, %v806_v14  ;;  %v807_v25 = vadd.f32 %v790_v60, %v2061_v3 }
 0x22a   : > { %v900_v57 = vrot.slane %v899_v7, 4  ;;  %v884_v42 = vadd.f32 %v2084_v1, %v870_v39  ;;  %v792_v16 = vpop.permute.xlu0 %791  ;;  %v1256_v40 = vmax.f32 %v1254_v52, %v1255_v35  ;;  %v1264_v4 = vrot.slane %v1263_v33, 2 }
 0x22b   : > { %v907_v63 = vsel %vm896_vm5, %v891_v41, -inf  ;;  %v885_v19 = vadd.f32 %v2084_v1, %v871_v62  ;;  %v872_v23 = vadd.f32 %v2055_v44, %v807_v25  ;;  %v808_v43 = vadd.f32 %v792_v16, %v2065_v5 }
 0x22c   : > { %v901_v38 = vmax.f32 %v899_v7, %v900_v57  ;;  %v908_v17 = vmax.f32 %v906_v18, %v907_v63  ;;  %v892_v26 = vmax.f32 %v884_v42, 0.0  ;;  %v1257_v20 = vrot.slane %v1256_v40, 1 }
 0x22d   : > { %v893_v3 = vmax.f32 %v885_v19, 0.0  ;;  %v886_v45 = vadd.f32 %v2084_v1, %v872_v23  ;;  %v873_v11 = vadd.f32 %v2073_v47, %v808_v43  ;;  %v1249_v54 = vmax.f32 %v1241_v59, 0.0 }
 0x22e   : > { %v902_v50 = vrot.slane %v901_v38, 2  ;;  %v909_v6 = vrot.slane %v908_v17, 4  ;;  %v915_v37 = vsel %vm896_vm5, %v892_v26, -inf  ;;  %v1265_v58 = vmax.f32 %v1263_v33, %v1264_v4 }
 0x22f   : > { %v916_v29 = vsel %vm896_vm5, %v893_v3, -inf  ;;  %v894_v44 = vmax.f32 %v886_v45, 0.0  ;;  %v887_v5 = vadd.f32 %v2084_v1, %v873_v11  ;;  %v1271_v61 = vrot.slane %v1270_v56, 4 }
 0x230   : > { %v903_v27 = vmax.f32 %v901_v38, %v902_v50  ;;  %v910_v22 = vmax.f32 %v908_v17, %v909_v6  ;;  %v917_v46 = vmax.f32 %v915_v37, %v916_v29  ;;  %v1258_v47 = vmax.f32 %v1256_v40, %v1257_v20 }
 0x231   : > { %v924_v12 = vsel %vm896_vm5, %v894_v44, -inf  ;;  %v895_v32 = vmax.f32 %v887_v5, 0.0  ;;  %v1266_v51 = vrot.slane %v1265_v58, 1  ;;  %v1272_v48 = vmax.f32 %v1270_v56, %v1271_v61 }
 0x232   : > { %v911_v0 = vrot.slane %v910_v22, 2  ;;  %v918_v21 = vrot.slane %v917_v46, 4  ;;  %v1277_v49 = vsel %vm896_vm5, %v1248_v13, -inf  ;;  %v904_v10 = vrot.slane %v903_v27, 1 }
 0x233   : > { %v925_v36 = vsel %vm896_vm5, %v895_v32, -inf  ;;  %v1267_v28 = vmax.f32 %v1265_v58, %v1266_v51  ;;  %v1278_v1 = vsel %vm896_vm5, %v1249_v54, -inf  ;;  %v1273_v53 = vrot.slane %v1272_v48, 2 }
 0x234   : > { %v912_v55 = vmax.f32 %v910_v22, %v911_v0  ;;  %v919_v2 = vmax.f32 %v917_v46, %v918_v21  ;;  %v926_v9 = vmax.f32 %v924_v12, %v925_v36  ;;  %v1279_v34 = vmax.f32 %v1277_v49, %v1278_v1 }
 0x235   : > { %v1301_v59 = vsel %vm1290_vm6, %v1267_v28, %v1258_v47  ;;  %v1274_v24 = vmax.f32 %v1272_v48, %v1273_v53  ;;  %v905_v8 = vmax.f32 %v903_v27, %v904_v10 }
 0x236   : > { %v913_v52 = vrot.slane %v912_v55, 1  ;;  %v920_v15 = vrot.slane %v919_v2, 2  ;;  %v927_v31 = vrot.slane %v926_v9, 4  ;;  %v1280_v56 = vrot.slane %v1279_v34, 4 }
 0x237   : > { %v1275_v30 = vrot.slane %v1274_v24, 1 }
 0x238   : > { %v921_v14 = vmax.f32 %v919_v2, %v920_v15  ;;  %v928_v7 = vmax.f32 %v926_v9, %v927_v31  ;;  %v914_v39 = vmax.f32 %v912_v55, %v913_v52  ;;  %v1281_v60 = vmax.f32 %v1279_v34, %v1280_v56 }
 0x239   : > { %v1276_v35 = vmax.f32 %v1274_v24, %v1275_v30 }
 0x23a   : > { %v929_v13 = vrot.slane %v928_v7, 2  ;;  %v922_v18 = vrot.slane %v921_v14, 1  ;;  %v1291_v41 = vsel %vm1290_vm6, %v914_v39, %v905_v8  ;;  %v1282_v62 = vrot.slane %v1281_v60, 2 }
 0x23b   : > { %v1302_v25 = vsel %vm1292_vm7, %v1276_v35, %v1301_v59 }
 0x23c   : > { %v923_v57 = vmax.f32 %v921_v14, %v922_v18  ;;  %v930_v42 = vmax.f32 %v928_v7, %v929_v13  ;;  %v1283_v16 = vmax.f32 %v1281_v60, %v1282_v62 }
 0x23e   : > { %v1293_v40 = vsel %vm1292_vm7, %v923_v57, %v1291_v41  ;;  %v931_v33 = vrot.slane %v930_v42, 1  ;;  %v1284_v63 = vrot.slane %v1283_v16, 1 }
 0x240   : > { %v932_v19 = vmax.f32 %v930_v42, %v931_v33  ;;  %v1285_v23 = vmax.f32 %v1283_v16, %v1284_v63 }
 0x242   : > { %v1295_v43 = vsel %vm1294_vm8, %v932_v19, %v1293_v40  ;;  %v1303_v38 = vsel %vm1294_vm8, %v1285_v23, %v1302_v25 }
 0x243   : > { %1304 = vrot.lane.b32.xlu1 %v1303_v38, %s1588_s27 }
 0x2b5   : > { %v1305_v17 = vpop.permute.xlu1 %1304 }
 0x2b6   : > { %v1307_v26 = vsel %vm896_vm5, %v1295_v43, %v1305_v17 }
 0x2b7   : > { %1308 = vst [vmem:[%s211_s23] sm:$0xf] %v1307_v26 }
 0x2b8   : > { %1536 = shalt.err (!%p1533_p3)
}
 0x2b9   : > { %s1537_s10 = scalar_lea.hbm %s2273_s5, 64  ;;  %s1541_s22 = scalar_lea.hbm %s2320_s4, 128 }
 0x2ba   : > { %p1538_p4 = scmp.ne.s32.totalorder %s2273_s5, %s1537_s10  ;;  %p1542_p9 = scmp.lt.u32.totalorder %s2273_s5, %s2320_s4 }
 0x2bb   : > { %p1543_p10 = scmp.lt.u32.totalorder %s1541_s22, %s1537_s10  ;;  %p1545_p12 = scmp.lt.u32.totalorder %s1537_s10, %s2273_s5 }
 0x2bc   : > { %p1539_p7 = pnand %p1538_p4, %p1653_p5 }
 0x2bd   : > { %p1544_p11 = por %p1543_p10, %p1542_p9 }
 0x2be   : > { %p1540_p8 = pneg %p1539_p7 }
 0x2bf   : > { %p1546_p13 = por %p1545_p12, %p1544_p11 }
 0x2c1   : > { %p1547_p0 = pnand %p1546_p13, %p1540_p8 }
 0x2c3   : > { %1550 = shalt.err (!%p1547_p0)
}
 0x2c4   : > { %1444 = dma.vmem_to_hbm [thread:$0]  (%p1653_p5), %s2275_s28, 64, %s2273_s5, %s1310_s6  }
 0x2c5 PF: > { %p1450_p1 = scmp.ge.s32.totalorder %s1585_s18, 2  ;;  %s1335_s14 = sand.u32 1, %s1573_s15  }
 0x2c6   : > { %s1336_s20 = scalar_lea.sflag [#allocation3], %s1335_s14 }
 0x2c7   : > { %p1447_p2 = pnand %p1450_p1, %p1657_p6 }
 0x2c9   : > { %1568 = dma.done.wait (!%p1447_p2), %s1336_s20, 64  }
 0x2ca   : > { %1570 = vsyncadd (!%p1447_p2), %s1336_s20, 4294967232  ;;  %p14_p3 = scmp.ge.s32.totalorder %s1640_s21, 4   ;;  %s2367_s15 = smov %s1577_s16 }
 0x2cb   : > { %s2368_s16 = smov %s1581_s17  ;;  %s2369_s17 = smov %s1651_s24 }
 0x2cc   : > { %s2370_s18 = smov %s1640_s21  ;;  %16 = sbr.rel (!%p14_p3) target bundleno = 3 (0x3), region = 74 }
 0x2d3   :  { %1341 = vsyncpa [#allocation3], 1 }
 0x2d4   :  { %1343 = vsyncpa [#allocation3 + $0x1], 1 }

</bundles_post_ra>
